<compile_context>
chip_gen: v6e
topology: v6e:2x2x1
jax: 0.10.0
libtpu: 0.0.40
codegen_flags: <defaults>
</compile_context>

<pallas_src>
import functools

import jax
import jax.numpy as jnp
from jax.experimental import pallas as pl
from jax.experimental.pallas import tpu as pltpu

OUT_CH = 16  # A3TGCN2 hidden size (hard-coded to 16 in the PyTorch module)


# ----------------------------- Pallas kernel ------------------------------- #
def temporal_gnn_kernel(x_ref, a_ref, wbig_ref, bbig_ref, s_ref,
                        whead_ref, bhead_ref, o_ref, *, half):
    """Single grid step; everything vectorized over (B, P) in the lane dim.

    x_ref    : (N, B*P*Fin)      node features, columns ordered (b, p, f)
    a_ref    : (N, N)            dense normalized adjacency
    wbig_ref : (B*P*Fin, 2*B*P*16)  block-diag fused GCN+gate weights
                                  (z-columns first, h-columns second)
    bbig_ref : (1, 2*B*P*16)     fused biases
    s_ref    : (B*P*16, B*16)    attention-weighted period reduction (probs (x) I)
    whead_ref: (B*16, B*f)       block-diag head weights
    bhead_ref: (1, B*f)          head bias (tiled over B)
    o_ref    : (N, B*f)
    """
    # X @ W_big : lane-dense (contraction B*P*Fin, lanes 2*B*P*16 = 512)
    xw = jnp.dot(x_ref[...], wbig_ref[...], preferred_element_type=jnp.float32)
    # A @ (X W) + b : lane-dense (16 x 16) @ (16 x 512)
    c = jnp.dot(a_ref[...], xw, preferred_element_type=jnp.float32) + bbig_ref[...]

    z = jax.nn.sigmoid(c[:, :half])         # (N, B*P*16)
    h_tilde = jnp.tanh(c[:, half:])         # (N, B*P*16)
    g = (1.0 - z) * h_tilde                 # H == 0 -> h_new = (1 - z) * h_tilde

    # attention-weighted sum over periods: one matmul with probs (x) I_16
    acc = jnp.dot(g, s_ref[...], preferred_element_type=jnp.float32)   # (N, B*16)

    h_relu = jnp.maximum(acc, 0.0)
    o_ref[...] = (jnp.dot(h_relu, whead_ref[...], preferred_element_type=jnp.float32)
                  + bhead_ref[...]).astype(o_ref.dtype)


# ------------------------------ glue (JAX) --------------------------------- #
def build_norm_adj(edge_index, edge_weight, n):
    """Dense D^-1/2 (A + I) D^-1/2, matching PyG gcn_norm (add_self_loops=True).

    Assumes the provided edge_index contains no self loops (true for the
    example graph built below)."""
    src, dst = edge_index[0], edge_index[1]
    a = jnp.zeros((n, n), jnp.float32).at[dst, src].add(edge_weight)
    a = a + jnp.eye(n, dtype=jnp.float32)
    deg = a.sum(axis=1)
    dinv = jnp.where(deg > 0, 1.0 / jnp.sqrt(deg), 0.0)
    return dinv[:, None] * a * dinv[None, :]


def temporal_gnn_forward(x, edge_index, edge_weight, params):
    """x: (B, N, F_in, periods) float32 -> (B, N, f) float32."""
    B, N, Fin, P = x.shape
    f_out = params["wlin"].shape[1]
    bp = B * P

    a_norm = build_norm_adj(edge_index, edge_weight, N)
    probs = jax.nn.softmax(params["attention"]).astype(jnp.float32)      # (P,)

    # ---- parameter fusion (all parameter-only preprocessing) ----
    # H == 0 every period in A3TGCN2, so each gate collapses to
    #   sigmoid/tanh( A @ X @ (W_gcn @ W_lin[:16]) + (b_gcn @ W_lin[:16] + b_lin) )
    wfz = params["wz"] @ params["wlz"][:OUT_CH]                      # (Fin, 16)
    bfz = params["bz"] @ params["wlz"][:OUT_CH] + params["blz"]      # (1, 16)
    wfh = params["wh"] @ params["wlh"][:OUT_CH]                      # (Fin, 16)
    bfh = params["bh"] @ params["wlh"][:OUT_CH] + params["blh"]      # (1, 16)

    eye_bp = jnp.eye(bp, dtype=jnp.float32)
    eye_b = jnp.eye(B, dtype=jnp.float32)
    eye_c = jnp.eye(OUT_CH, dtype=jnp.float32)

    # block-diagonal per-(b, p) fused weights; z-columns first, h-columns second
    w_big = jnp.concatenate([jnp.kron(eye_bp, wfz),
                             jnp.kron(eye_bp, wfh)], axis=1)      # (bp*Fin, 2*bp*16)
    b_big = jnp.concatenate([jnp.tile(bfz, (1, bp)),
                             jnp.tile(bfh, (1, bp))], axis=1)     # (1, 2*bp*16)

    # attention-weighted reduction over periods as a single matmul (b,p,c)->(b,c)
    s_big = jnp.kron(eye_b, jnp.kron(probs[:, None], eye_c))      # (bp*16, B*16)

    # head Linear applied per batch block
    w_head = jnp.kron(eye_b, params["wlin"])                      # (B*16, B*f)
    b_head = jnp.tile(params["blin"], (1, B))                     # (1, B*f)

    # lane-dense node features: (N, B*P*Fin), columns ordered (b, p, f)
    x_all = jnp.transpose(x, (1, 0, 3, 2)).reshape(N, bp * Fin)

    kernel = functools.partial(temporal_gnn_kernel, half=bp * OUT_CH)
    vmem_spec = pl.BlockSpec(memory_space=pltpu.MemorySpace.VMEM)

    out_flat = pl.pallas_call(
        kernel,
        out_shape=jax.ShapeDtypeStruct((N, B * f_out), jnp.float32),
        in_specs=[vmem_spec] * 7,
        out_specs=vmem_spec,
    )(x_all, a_norm, w_big, b_big, s_big, w_head, b_head)

    # (N, B*f) -> (B, N, f)
    return jnp.transpose(out_flat.reshape(N, B, f_out), (1, 0, 2))


# ---------------------- pure-JAX reference (unfused) ------------------------ #
def reference_forward(x, a_norm, params):
    """Unfused reference with the full TGCN2 gate structure (r gate, cat, H=0)."""
    probs = jax.nn.softmax(params["attention"])
    B, N, Fin, P = x.shape
    acc = jnp.zeros((B, N, OUT_CH), jnp.float32)
    for t in range(P):
        xt = x[..., t]                                            # (B, N, Fin)

        def gcn(w, b):
            return jnp.einsum("mn,bnc->bmc", a_norm, xt @ w) + b

        cz = gcn(params["wz"], params["bz"])
        cr = gcn(params["wr"], params["br"])
        ch = gcn(params["wh"], params["bh"])
        h = jnp.zeros((B, N, OUT_CH), jnp.float32)
        z = jax.nn.sigmoid(jnp.concatenate([cz, h], -1) @ params["wlz"] + params["blz"])
        r = jax.nn.sigmoid(jnp.concatenate([cr, h], -1) @ params["wlr"] + params["blr"])
        ht = jnp.tanh(jnp.concatenate([ch, h * r], -1) @ params["wlh"] + params["blh"])
        hn = z * h + (1.0 - z) * ht
        acc = acc + probs[t] * hn
    return jnp.maximum(acc, 0.0) @ params["wlin"] + params["blin"]


# ------------------------------ parameters --------------------------------- #
def init_params(key, node_features, periods, f_out):
    ks = jax.random.split(key, 14)

    def u(k, shape, scale=0.3):
        return jax.random.uniform(k, shape, jnp.float32, -scale, scale)

    return {
        # GCNConv weights stored as (in, out); biases as (1, out)
        "wz": u(ks[0], (node_features, OUT_CH)), "bz": u(ks[1], (1, OUT_CH)),
        "wr": u(ks[2], (node_features, OUT_CH)), "br": u(ks[3], (1, OUT_CH)),
        "wh": u(ks[4], (node_features, OUT_CH)), "bh": u(ks[5], (1, OUT_CH)),
        # gate Linears: torch weight (OUT_CH, 2*OUT_CH) stored transposed (2*OUT_CH, OUT_CH)
        "wlz": u(ks[6], (2 * OUT_CH, OUT_CH)), "blz": u(ks[7], (1, OUT_CH)),
        "wlr": u(ks[8], (2 * OUT_CH, OUT_CH)), "blr": u(ks[9], (1, OUT_CH)),
        "wlh": u(ks[10], (2 * OUT_CH, OUT_CH)), "blh": u(ks[11], (1, OUT_CH)),
        # final Linear(16, f): stored transposed (16, f)
        "wlin": u(ks[12], (OUT_CH, f_out)), "blin": u(ks[13], (1, f_out)),
        # A3TGCN2 attention parameter over periods
        "attention": jax.random.uniform(jax.random.fold_in(key, 99), (periods,), jnp.float32),
    }


# --------------------------------- main ------------------------------------ #
if __name__ == "__main__":
    B, N, FIN, PERIODS, F_OUT = 2, 16, 4, 8, 8

    key = jax.random.PRNGKey(0)
    kx, kw, ke = jax.random.split(key, 3)

    # x in the PyTorch convention: (batch, num_nodes, node_features, periods)
    x = jax.random.normal(kx, (B, N, FIN, PERIODS), jnp.float32)

    # deterministic bidirectional ring graph (no self loops) + random weights
    src = jnp.arange(N, dtype=jnp.int32)
    dst = (src + 1) % N
    edge_index = jnp.stack([jnp.concatenate([src, dst]),
                            jnp.concatenate([dst, src])])          # (2, 2N)
    edge_weight = jax.random.uniform(ke, (2 * N,), jnp.float32, 0.5, 1.5)

    params = init_params(kw, FIN, PERIODS, F_OUT)

    out = temporal_gnn_forward(x, edge_index, edge_weight, params)
    out = jax.block_until_ready(out)
    assert out.shape == (B, N, F_OUT)

    ref = reference_forward(x, build_norm_adj(edge_index, edge_weight, N), params)
    assert jnp.allclose(out, ref, atol=1e-2, rtol=1e-2), \
        f"max abs err {float(jnp.max(jnp.abs(out - ref)))}"

    print("KERNEL_OK")
</pallas_src>

<mosaic_0001>
module attributes {stable_mosaic.version = 11 : i64} {
  func.func @temporal_gnn_kernel(%arg0: memref<16x64xf32, #tpu.memory_space<vmem>>, %arg1: memref<16x16xf32, #tpu.memory_space<vmem>>, %arg2: memref<64x512xf32, #tpu.memory_space<vmem>>, %arg3: memref<1x512xf32, #tpu.memory_space<vmem>>, %arg4: memref<256x32xf32, #tpu.memory_space<vmem>>, %arg5: memref<32x16xf32, #tpu.memory_space<vmem>>, %arg6: memref<1x16xf32, #tpu.memory_space<vmem>>, %arg7: memref<16x16xf32, #tpu.memory_space<vmem>>) attributes {dimension_semantics = [], scalar_prefetch = 0 : i64, scratch_operands = 0 : i64, tpu.core_type = #tpu.core_type<tc>} {
    %c0 = arith.constant 0 : index
    %c0_0 = arith.constant 0 : index
    %0 = vector.load %arg0[%c0, %c0_0] : memref<16x64xf32, #tpu.memory_space<vmem>>, vector<16x64xf32>
    %c0_1 = arith.constant 0 : index
    %c0_2 = arith.constant 0 : index
    %1 = vector.load %arg2[%c0_1, %c0_2] : memref<64x512xf32, #tpu.memory_space<vmem>>, vector<64x512xf32>
    %cst = arith.constant dense<0.000000e+00> : vector<16x512xf32>
    %2 = tpu.matmul %0, %1, %cst {dimension_numbers = #tpu.dot_dimension_numbers<[1], [0], [0], [1], [0, 0, 1, 1], [], []>} : vector<16x64xf32>, vector<64x512xf32>, vector<16x512xf32> -> vector<16x512xf32>
    %c0_3 = arith.constant 0 : index
    %c0_4 = arith.constant 0 : index
    %3 = vector.load %arg1[%c0_3, %c0_4] : memref<16x16xf32, #tpu.memory_space<vmem>>, vector<16x16xf32>
    %cst_5 = arith.constant dense<0.000000e+00> : vector<16x512xf32>
    %4 = tpu.matmul %3, %2, %cst_5 {dimension_numbers = #tpu.dot_dimension_numbers<[1], [0], [0], [1], [0, 0, 1, 1], [], []>} : vector<16x16xf32>, vector<16x512xf32>, vector<16x512xf32> -> vector<16x512xf32>
    %c0_6 = arith.constant 0 : index
    %c0_7 = arith.constant 0 : index
    %5 = vector.load %arg3[%c0_6, %c0_7] : memref<1x512xf32, #tpu.memory_space<vmem>>, vector<1x512xf32>
    %6 = vector.broadcast %5 : vector<1x512xf32> to vector<16x512xf32>
    %7 = arith.addf %4, %6 : vector<16x512xf32>
    %8 = vector.extract_strided_slice %7 {offsets = [0, 0], sizes = [16, 256], strides = [1, 1]} : vector<16x512xf32> to vector<16x256xf32>
    %9 = arith.negf %8 : vector<16x256xf32>
    %10 = math.exp %9 : vector<16x256xf32>
    %cst_8 = arith.constant 1.000000e+00 : f32
    %11 = vector.broadcast %cst_8 : f32 to vector<16x256xf32>
    %12 = arith.addf %11, %10 : vector<16x256xf32>
    %13 = arith.divf %11, %12 : vector<16x256xf32>
    %14 = vector.extract_strided_slice %7 {offsets = [0, 256], sizes = [16, 256], strides = [1, 1]} : vector<16x512xf32> to vector<16x256xf32>
    %15 = math.tanh %14 : vector<16x256xf32>
    %cst_9 = arith.constant 1.000000e+00 : f32
    %16 = vector.broadcast %cst_9 : f32 to vector<16x256xf32>
    %17 = arith.subf %16, %13 : vector<16x256xf32>
    %18 = arith.mulf %17, %15 : vector<16x256xf32>
    %c0_10 = arith.constant 0 : index
    %c0_11 = arith.constant 0 : index
    %19 = vector.load %arg4[%c0_10, %c0_11] : memref<256x32xf32, #tpu.memory_space<vmem>>, vector<256x32xf32>
    %cst_12 = arith.constant dense<0.000000e+00> : vector<16x32xf32>
    %20 = tpu.matmul %18, %19, %cst_12 {dimension_numbers = #tpu.dot_dimension_numbers<[1], [0], [0], [1], [0, 0, 1, 1], [], []>} : vector<16x256xf32>, vector<256x32xf32>, vector<16x32xf32> -> vector<16x32xf32>
    %cst_13 = arith.constant 0.000000e+00 : f32
    %21 = vector.broadcast %cst_13 : f32 to vector<16x32xf32>
    %22 = arith.maximumf %20, %21 : vector<16x32xf32>
    %c0_14 = arith.constant 0 : index
    %c0_15 = arith.constant 0 : index
    %23 = vector.load %arg5[%c0_14, %c0_15] : memref<32x16xf32, #tpu.memory_space<vmem>>, vector<32x16xf32>
    %cst_16 = arith.constant dense<0.000000e+00> : vector<16x16xf32>
    %24 = tpu.matmul %22, %23, %cst_16 {dimension_numbers = #tpu.dot_dimension_numbers<[1], [0], [0], [1], [0, 0, 1, 1], [], []>} : vector<16x32xf32>, vector<32x16xf32>, vector<16x16xf32> -> vector<16x16xf32>
    %c0_17 = arith.constant 0 : index
    %c0_18 = arith.constant 0 : index
    %25 = vector.load %arg6[%c0_17, %c0_18] : memref<1x16xf32, #tpu.memory_space<vmem>>, vector<1x16xf32>
    %26 = vector.broadcast %25 : vector<1x16xf32> to vector<16x16xf32>
    %27 = arith.addf %24, %26 : vector<16x16xf32>
    %c0_19 = arith.constant 0 : index
    %c0_20 = arith.constant 0 : index
    %28 = vector.load %arg7[%c0_19, %c0_20] : memref<16x16xf32, #tpu.memory_space<vmem>>, vector<16x16xf32>
    tpu.vector_store %arg7[%c0_19, %c0_20], %27 {strides = array<i32>} : memref<16x16xf32, #tpu.memory_space<vmem>>, vector<16x16xf32>,
    return
  }
}

</mosaic_0001>

<bundles_post_ra>
// kernel: tpu_custom_call.1
= control target key start
LH: loop header
LB: loop body
LE: loop exit
PB: predicated region body
PF: predicated region fallthrough
CT: control target
= control target key end

     0   :  { %v783_v4 = vmov 0.0   ;;  %s1070_s0 = inlined_call_operand.vmem [shape: f32[16,64], index: 0, kind: input, shape index: {}]   ;;  %s1071_s1 = inlined_call_operand.vmem [shape: f32[16,16], index: 1, kind: input, shape index: {}]   ;;  %s1072_s2 = inlined_call_operand.vmem [shape: f32[64,512], index: 2, kind: input, shape index: {}]   ;;  %s1073_s3 = inlined_call_operand.vmem [shape: f32[1,512], index: 3, kind: input, shape index: {}]   ;;  %s1074_s4 = inlined_call_operand.vmem [shape: f32[256,32], index: 4, kind: input, shape index: {}]   ;;  %s1075_s5 = inlined_call_operand.vmem [shape: f32[32,16], index: 5, kind: input, shape index: {}]   ;;  %s1076_s6 = inlined_call_operand.vmem [shape: f32[1,16], index: 6, kind: input, shape index: {}]   ;;  %s1077_s7 = inlined_call_operand.hbm [shape: f32[16,16], index: 7, kind: output, shape index: {}]  }
   0x1   :  { %v58_v0 = vld [vmem:[%s1072_s2 + $0xe8] sm:$0xff]  ;;  %v57_v1 = vld [vmem:[%s1072_s2 + $0xe0] sm:$0xff]  ;;  %132 = vmatprep.mubr.f32.mxu1 %v783_v4  ;;  %317 = vmatprep.mubr.f32.mxu0 %v783_v4 }
   0x2   :  { %v54_v2 = vld [vmem:[%s1072_s2 + $0xc8] sm:$0xff]  ;;  %84 = vmatprep.subr.mxu1 %v58_v0  ;;  %v53_v3 = vld [vmem:[%s1072_s2 + $0xc0] sm:$0xff] }
   0x3   :  { %85 = vmatpush1.msra.mxu1 %v57_v1  ;;  %v50_v5 = vld [vmem:[%s1072_s2 + $0xa8] sm:$0xff]  ;;  %v49_v6 = vld [vmem:[%s1072_s2 + $0xa0] sm:$0xff] }
   0x4   :  { %86 = vmatprep.subr.mxu1 %v54_v2  ;;  %v46_v7 = vld [vmem:[%s1072_s2 + $0x88] sm:$0xff]  ;;  %v45_v8 = vld [vmem:[%s1072_s2 + $0x80] sm:$0xff] }
   0x5   :  { %87 = vmatpush1.msra.mxu1 %v53_v3  ;;  %v42_v9 = vld [vmem:[%s1072_s2 + $0x68] sm:$0xff]  ;;  %v41_v10 = vld [vmem:[%s1072_s2 + $0x60] sm:$0xff] }
   0x6   :  { %88 = vmatprep.subr.mxu1 %v50_v5  ;;  %v38_v11 = vld [vmem:[%s1072_s2 + $0x48] sm:$0xff]  ;;  %v37_v12 = vld [vmem:[%s1072_s2 + $0x40] sm:$0xff] }
   0x7   :  { %89 = vmatpush1.msra.mxu1 %v49_v6  ;;  %v34_v13 = vld [vmem:[%s1072_s2 + $0x28] sm:$0xff]  ;;  %v33_v14 = vld [vmem:[%s1072_s2 + $0x20] sm:$0xff] }
   0x8   :  { %90 = vmatprep.subr.mxu1 %v46_v7 }
   0x9   :  { %91 = vmatpush1.msra.mxu1 %v45_v8 }
   0xa   :  { %92 = vmatprep.subr.mxu1 %v42_v9 }
   0xb   :  { %93 = vmatpush1.msra.mxu1 %v41_v10 }
   0xc   :  { %94 = vmatprep.subr.mxu1 %v38_v11 }
   0xd   :  { %12 = vsyncpa [#allocation3], 0  ;;  %95 = vmatpush1.msra.mxu1 %v37_v12  ;;  %v30_v15 = vld [vmem:[%s1072_s2 + $0x8] sm:$0xff]  ;;  %v29_v16 = vld [vmem:[%s1072_s2] sm:$0xff]  ;;  %vm61_vm0 = vcmask 523264   ;;  %vm246_vm1 = vcmask 130048  }
   0xe   :  { %96 = vmatprep.subr.mxu1 %v34_v13  ;;  %v27_v17 = vld [vmem:[%s1070_s0] sm:$0xff]  ;;  %v60_v18 = vld [vmem:[%s1072_s2 + $0xf8] sm:$0xff]  ;;  %v59_v19 = vld [vmem:[%s1072_s2 + $0xf0] sm:$0xff]  ;;  %v226_v13 = vlaneseq  ;;  %vm563_vm2 = vcmask 261120   ;;  %s784_s22 = smov [#allocation2]  }
   0xf   :  { %97 = vmatpush1.msra.mxu1 %v33_v14  ;;  %v56_v20 = vld [vmem:[%s1072_s2 + $0xd8] sm:$0xff]  ;;  %v55_v21 = vld [vmem:[%s1072_s2 + $0xd0] sm:$0xff]  ;;  %v28_v22 = vld [vmem:[%s1070_s0 + $0x8] sm:$0xff]  ;;  %s652_s23 = sshll.u32 %s784_s22, 4  ;;  %s653_s23 = int_to_ptr.vmem [resolvable:$true] %s652_s23 }
  0x10   :  { %98 = vmatprep.subr.mxu1 %v30_v15  ;;  %v52_v23 = vld [vmem:[%s1072_s2 + $0xb8] sm:$0xff]  ;;  %v51_v24 = vld [vmem:[%s1072_s2 + $0xb0] sm:$0xff]  ;;  %v222_v39 = vld [vmem:[%s1071_s1] sm:$0xff]  ;;  %v227_v14 = vshrl.u32 %v226_v13, 7  ;;  %p766_p1 = scmp.lt.s32.totalorder %s653_s23, %s653_s23 }
  0x11   :  { %99 = vmatpush1.msra.mxu1 %v29_v16  ;;  %v48_v25 = vld [vmem:[%s1072_s2 + $0x98] sm:$0xff]  ;;  %v47_v26 = vld [vmem:[%s1072_s2 + $0x90] sm:$0xff]  ;;  %v223_v40 = vld [vmem:[%s1071_s1 + $0x8] sm:$0xff] }
  0x12   :  { %663 = vmatmul.mubr.msk.f32.vlgmr.msra.gmra.mxu1 %vm61_vm0, %v27_v17  ;;  %161 = vmatprep.subr.mxu1 %v60_v18  ;;  %v44_v27 = vld [vmem:[%s1072_s2 + $0x78] sm:$0xff]  ;;  %v43_v28 = vld [vmem:[%s1072_s2 + $0x70] sm:$0xff]  ;;  %v472_v49 = vld [vmem:[%s1074_s4 + $0xe8] sm:$0xff]  ;;  %v228_v15 = vsub.s32 0, %v227_v14 }
  0x13   :  { %162 = vmatpush1.msra.mxu1 %v59_v19  ;;  %138 = vmatprep.mubr.f32.mxu1 %v783_v4  ;;  %v40_v29 = vld [vmem:[%s1072_s2 + $0x58] sm:$0xff]  ;;  %v39_v30 = vld [vmem:[%s1072_s2 + $0x50] sm:$0xff]  ;;  %v456_v50 = vld [vmem:[%s1074_s4 + $0x68] sm:$0xff] }
  0x14   :  { %163 = vmatprep.subr.mxu1 %v56_v20  ;;  %v36_v31 = vld [vmem:[%s1072_s2 + $0x38] sm:$0xff]  ;;  %v35_v32 = vld [vmem:[%s1072_s2 + $0x30] sm:$0xff]  ;;  %v471_v51 = vld [vmem:[%s1074_s4 + $0xe0] sm:$0xff] }
  0x15   :  { %164 = vmatpush1.msra.mxu1 %v55_v21  ;;  %v32_v33 = vld [vmem:[%s1072_s2 + $0x18] sm:$0xff]  ;;  %v31_v34 = vld [vmem:[%s1072_s2 + $0x10] sm:$0xff]  ;;  %v455_v52 = vld [vmem:[%s1074_s4 + $0x60] sm:$0xff] }
  0x16   :  { %664 = vmatmul.mubr.msk.f32.gmra.mxu1 %vm61_vm0, %v28_v22  ;;  %165 = vmatprep.subr.mxu1 %v52_v23  ;;  %v474_v45 = vld [vmem:[%s1074_s4 + $0xf8] sm:$0xff]  ;;  %v473_v47 = vld [vmem:[%s1074_s4 + $0xf0] sm:$0xff]  ;;  %v468_v57 = vld [vmem:[%s1074_s4 + $0xc8] sm:$0xff] }
  0x17   :  { %166 = vmatpush1.msra.mxu1 %v51_v24  ;;  %209 = vmatprep.mubr.f32.mxu1 %v783_v4  ;;  %v458_v46 = vld [vmem:[%s1074_s4 + $0x78] sm:$0xff]  ;;  %v457_v48 = vld [vmem:[%s1074_s4 + $0x70] sm:$0xff]  ;;  %v452_v58 = vld [vmem:[%s1074_s4 + $0x48] sm:$0xff] }
  0x18   :  { %167 = vmatprep.subr.mxu1 %v48_v25  ;;  %v470_v53 = vld [vmem:[%s1074_s4 + $0xd8] sm:$0xff]  ;;  %v469_v55 = vld [vmem:[%s1074_s4 + $0xd0] sm:$0xff]  ;;  %v467_v59 = vld [vmem:[%s1074_s4 + $0xc0] sm:$0xff] }
  0x19   :  { %168 = vmatpush1.msra.mxu1 %v47_v26  ;;  %v454_v54 = vld [vmem:[%s1074_s4 + $0x58] sm:$0xff]  ;;  %v453_v56 = vld [vmem:[%s1074_s4 + $0x50] sm:$0xff]  ;;  %v451_v60 = vld [vmem:[%s1074_s4 + $0x40] sm:$0xff] }
  0x1a   :  { %169 = vmatprep.subr.mxu1 %v44_v27  ;;  %v466_v61 = vld [vmem:[%s1074_s4 + $0xb8] sm:$0xff]  ;;  %v465_v63 = vld [vmem:[%s1074_s4 + $0xb0] sm:$0xff]  ;;  %v464_v1 = vld [vmem:[%s1074_s4 + $0xa8] sm:$0xff] }
  0x1b   :  { %170 = vmatpush1.msra.mxu1 %v43_v28  ;;  %v450_v62 = vld [vmem:[%s1074_s4 + $0x38] sm:$0xff]  ;;  %v449_v0 = vld [vmem:[%s1074_s4 + $0x30] sm:$0xff]  ;;  %v448_v2 = vld [vmem:[%s1074_s4 + $0x28] sm:$0xff] }
  0x1c   :  { %171 = vmatprep.subr.mxu1 %v40_v29  ;;  %v463_v3 = vld [vmem:[%s1074_s4 + $0xa0] sm:$0xff]  ;;  %v462_v5 = vld [vmem:[%s1074_s4 + $0x98] sm:$0xff]  ;;  %v461_v7 = vld [vmem:[%s1074_s4 + $0x90] sm:$0xff] }
  0x1d   :  { %172 = vmatpush1.msra.mxu1 %v39_v30  ;;  %v446_v6 = vld [vmem:[%s1074_s4 + $0x18] sm:$0xff]  ;;  %v445_v8 = vld [vmem:[%s1074_s4 + $0x10] sm:$0xff]  ;;  %v460_v9 = vld [vmem:[%s1074_s4 + $0x88] sm:$0xff] }
  0x1e   :  { %173 = vmatprep.subr.mxu1 %v36_v31  ;;  %v444_v10 = vld [vmem:[%s1074_s4 + $0x8] sm:$0xff]  ;;  %v459_v11 = vld [vmem:[%s1074_s4 + $0x80] sm:$0xff] }
  0x1f   :  { %174 = vmatpush1.msra.mxu1 %v35_v32  ;;  %v443_v12 = vld [vmem:[%s1074_s4] sm:$0xff]  ;;  %v236_v32 = vsub.s32 2, %v227_v14 }
  0x20   :  { %175 = vmatprep.subr.mxu1 %v32_v33  ;;  %v224_v16 = vld [vmem:[%s1073_s3] sm:$0xf]  ;;  %v240_v33 = vsub.s32 3, %v227_v14 }
  0x21   :  { %176 = vmatpush1.msra.mxu1 %v31_v34  ;;  %v229_v18 = vrot.slane %v224_v16, %v228_v15  ;;  %v237_v34 = vrot.slane %v224_v16, %v236_v32 }
  0x22   :  { %665 = vmatmul.mubr.msk.f32.vlgmr.msra.gmra.mxu1 %vm61_vm0, %v27_v17  ;;  %v232_v17 = vsub.s32 1, %v227_v14 }
  0x23   :  { %215 = vmatprep.mubr.f32.mxu1 %v783_v4 }
  0x24   :  { %v233_v19 = vrot.slane %v224_v16, %v232_v17 }
  0x26   :  { %666 = vmatmul.mubr.msk.f32.gmra.mxu1 %vm61_vm0, %v28_v22 }
  0x27   :  { %394 = vmatprep.mubr.f32.mxu1 %v783_v4 }
  0xd2   :  { %v134_v35 = vpop.f32.mrf.mxu1 }
  0xd4   :  { %v136_v36 = vpop.f32.mrf.mxu1 }
  0xd6   :  { %v140_v37 = vpop.f32.mrf.mxu1 }
  0xd8   :  { %v142_v38 = vpop.f32.mrf.mxu1 }
  0xd9   :  { %281 = vmatprep.subr.mxu0 %v142_v38 }
  0xda   :  { %282 = vmatpush1.msra.mxu0 %v140_v37 }
  0xdb   :  { %283 = vmatprep.subr.mxu0 %v136_v36  ;;  %v241_v36 = vrot.slane %v224_v16, %v240_v33  ;;  %v675_v16 = vld [vmem:[%s1076_s6] ss:$0 sm:$0xff] }
  0xdc   :  { %284 = vmatpush1.msra.mxu0 %v134_v35 }
  0xdd   :  { %667 = vmatmul.mubr.msk.f32.vlgmr.msra.gmra.mxu0 %vm246_vm1, %v222_v39  ;;  %678 = vmatprep.subr.mxu0 %v474_v45 }
  0xde   :  { %323 = vmatprep.mubr.f32.mxu0 %v783_v4  ;;  %679 = vmatpush3.msra.mxu0 %v458_v46 }
  0xdf   :  { %680 = vmatprep.subr.mxu0 %v473_v47 }
  0xe0   :  { %681 = vmatpush3.msra.mxu0 %v457_v48 }
  0xe1   :  { %668 = vmatmul.mubr.msk.f32.gmra.mxu0 %vm246_vm1, %v223_v40  ;;  %682 = vmatprep.subr.mxu0 %v472_v49 }
  0xe2   :  { %v211_v41 = vpop.f32.mrf.mxu1  ;;  %683 = vmatpush3.msra.mxu0 %v456_v50 }
  0xe3   :  { %684 = vmatprep.subr.mxu0 %v471_v51 }
  0xe4   :  { %v213_v42 = vpop.f32.mrf.mxu1  ;;  %685 = vmatpush3.msra.mxu0 %v455_v52 }
  0xe5   :  { %686 = vmatprep.subr.mxu0 %v470_v53 }
  0xe6   :  { %v217_v43 = vpop.f32.mrf.mxu1  ;;  %687 = vmatpush3.msra.mxu0 %v454_v54 }
  0xe7   :  { %688 = vmatprep.subr.mxu0 %v469_v55 }
  0xe8   :  { %v219_v44 = vpop.f32.mrf.mxu1  ;;  %689 = vmatpush3.msra.mxu0 %v453_v56 }
  0xe9   :  { %358 = vmatprep.subr.mxu1 %v219_v44  ;;  %690 = vmatprep.subr.mxu0 %v468_v57 }
  0xea   :  { %359 = vmatpush1.msra.mxu1 %v217_v43  ;;  %691 = vmatpush3.msra.mxu0 %v452_v58 }
  0xeb   :  { %360 = vmatprep.subr.mxu1 %v213_v42  ;;  %692 = vmatprep.subr.mxu0 %v467_v59 }
  0xec   :  { %361 = vmatpush1.msra.mxu1 %v211_v41  ;;  %693 = vmatpush3.msra.mxu0 %v451_v60 }
  0xed   :  { %669 = vmatmul.mubr.msk.f32.vlgmr.msra.gmra.mxu1 %vm246_vm1, %v222_v39  ;;  %694 = vmatprep.subr.mxu0 %v466_v61 }
  0xee   :  { %400 = vmatprep.mubr.f32.mxu1 %v783_v4  ;;  %695 = vmatpush3.msra.mxu0 %v450_v62  ;;  %v447_v4 = vld [vmem:[%s1074_s4 + $0x20] sm:$0xff] }
  0xef   :  { %696 = vmatprep.subr.mxu0 %v465_v63 }
  0xf0   :  { %697 = vmatpush3.msra.mxu0 %v449_v0 }
  0xf1   :  { %670 = vmatmul.mubr.msk.f32.gmra.mxu1 %vm246_vm1, %v223_v40  ;;  %698 = vmatprep.subr.mxu0 %v464_v1 }
  0xf2   :  { %699 = vmatpush3.msra.mxu0 %v448_v2 }
  0xf3   :  { %700 = vmatprep.subr.mxu0 %v463_v3 }
  0xf4   :  { %701 = vmatpush3.msra.mxu0 %v447_v4  ;;  %v555_v4 = vld [vmem:[%s1075_s5 + $0x18] sm:$0xff] }
  0xf5   :  { %702 = vmatprep.subr.mxu0 %v462_v5  ;;  %v554_v5 = vld [vmem:[%s1075_s5 + $0x10] sm:$0xff] }
  0xf6   :  { %703 = vmatpush3.msra.mxu0 %v446_v6  ;;  %v553_v6 = vld [vmem:[%s1075_s5 + $0x8] sm:$0xff] }
  0xf7   :  { %704 = vmatprep.subr.mxu0 %v461_v7  ;;  %v552_v7 = vld [vmem:[%s1075_s5] sm:$0xff]  ;;  %s761_s5 = scalar_lea.vmem %s653_s23, 256 }
  0xf8   :  { %705 = vmatpush3.msra.mxu0 %v445_v8  ;;  %p762_p0 = scmp.ne.s32.totalorder %s653_s23, %s761_s5  ;;  %p767_p2 = scmp.lt.s32.totalorder %s761_s5, %s761_s5 }
  0xf9   :  { %706 = vmatprep.subr.mxu0 %v460_v9 }
  0xfa   :  { %707 = vmatpush3.msra.mxu0 %v444_v10  ;;  %p768_p3 = por %p767_p2, %p766_p1 }
  0xfb   :  { %708 = vmatprep.subr.mxu0 %v459_v11 }
  0xfc   :  { %709 = vmatpush3.msra.mxu0 %v443_v12  ;;  %p769_p4 = pnand %p768_p3, %p762_p0 }
  0xfd   :  { %722 = vmatprep.subr.mxu0 %v555_v4 }
 0x19d   :  { %v319_v20 = vpop.f32.mrf.mxu0 }
 0x19e   :  { %v320_v21 = vadd.f32 %v319_v20, %v229_v18 }
 0x19f   :  { %v321_v22 = vpop.f32.mrf.mxu0 }
 0x1a0   :  { %v671_v23 = vmul.f32 -1.442695, %v320_v21  ;;  %v322_v24 = vadd.f32 %v321_v22, %v233_v19 }
 0x1a1   :  { %v325_v25 = vpop.f32.mrf.mxu0 }
 0x1a2   :  { %737 = vpow2.f32 %v671_v23  ;;  %v672_v26 = vmul.f32 -1.442695, %v322_v24  ;;  %v326_v27 = vadd.f32 %v325_v25, %v229_v18 }
 0x1a3   :  { %v327_v28 = vpop.f32.mrf.mxu0 }
 0x1a4   :  { %739 = vpow2.f32 %v672_v26  ;;  %v673_v29 = vmul.f32 -1.442695, %v326_v27  ;;  %v328_v30 = vadd.f32 %v327_v28, %v233_v19 }
 0x1a6   :  { %741 = vpow2.f32 %v673_v29  ;;  %v674_v31 = vmul.f32 -1.442695, %v328_v30 }
 0x1a8   :  { %743 = vpow2.f32 %v674_v31 }
 0x1ad   :  { %v396_v35 = vpop.f32.mrf.mxu1 }
 0x1ae   :  { %v397_v38 = vadd.f32 %v396_v35, %v237_v34 }
 0x1af   :  { %v738_v37 = vpop.eup %737  ;;  %v398_v39 = vpop.f32.mrf.mxu1 }
 0x1b0   :  { %v419_v40 = vadd.f32 1.0, %v738_v37  ;;  %v399_v42 = vadd.f32 %v398_v39, %v241_v36 }
 0x1b1   :  { %v740_v41 = vpop.eup %739  ;;  %v402_v43 = vpop.f32.mrf.mxu1 }
 0x1b2   :  { %745 = vrcp.f32 %v419_v40  ;;  %v420_v44 = vadd.f32 1.0, %v740_v41  ;;  %v403_v49 = vadd.f32 %v402_v43, %v237_v34 }
 0x1b3   :  { %v742_v45 = vpop.eup %741  ;;  %747 = vtanh.f32 %v397_v38  ;;  %v404_v46 = vpop.f32.mrf.mxu1 }
 0x1b4   :  { %749 = vrcp.f32 %v420_v44  ;;  %v421_v47 = vadd.f32 1.0, %v742_v45  ;;  %v405_v51 = vadd.f32 %v404_v46, %v241_v36 }
 0x1b5   :  { %v744_v48 = vpop.eup %743  ;;  %751 = vtanh.f32 %v399_v42 }
 0x1b6   :  { %753 = vrcp.f32 %v421_v47  ;;  %v422_v50 = vadd.f32 1.0, %v744_v48 }
 0x1b8   :  { %755 = vrcp.f32 %v422_v50 }
 0x1b9   :  { %757 = vtanh.f32 %v403_v49 }
 0x1ba   :  { %759 = vtanh.f32 %v405_v51 }
 0x1bf   :  { %v746_v52 = vpop.eup %745 }
 0x1c0   :  { %v748_v53 = vpop.eup %747  ;;  %v435_v55 = vsub.f32 1.0, %v746_v52 }
 0x1c1   :  { %v750_v54 = vpop.eup %749 }
 0x1c2   :  { %v752_v56 = vpop.eup %751  ;;  %v436_v57 = vsub.f32 1.0, %v750_v54  ;;  %v439_v61 = vmul.f32 %v748_v53, %v435_v55 }
 0x1c3   :  { %v754_v58 = vpop.eup %753 }
 0x1c4   :  { %v440_v59 = vmul.f32 %v752_v56, %v436_v57  ;;  %v437_v62 = vsub.f32 1.0, %v754_v58 }
 0x1c5   :  { %v756_v60 = vpop.eup %755 }
 0x1c6   :  { %v758_v63 = vpop.eup %757  ;;  %539 = vmatprep.mubr.f32.mxu0 %v440_v59  ;;  %v438_v0 = vsub.f32 1.0, %v756_v60 }
 0x1c7   :  { %v760_v1 = vpop.eup %759  ;;  %540 = vmatmul.mubr.f32.vlgmr.msra.gmra.mxu0 %v439_v61  ;;  %v441_v3 = vmul.f32 %v758_v63, %v437_v62 }
 0x1c8   :  { %v442_v2 = vmul.f32 %v760_v1, %v438_v0  ;;  %723 = vmatpush3.msra.mxu0 %v555_v4 }
 0x1c9   :  { %724 = vmatprep.subr.mxu0 %v554_v5 }
 0x1ca   :  { %544 = vmatprep.mubr.f32.mxu0 %v442_v2  ;;  %725 = vmatpush3.msra.mxu0 %v554_v5 }
 0x1cb   :  { %545 = vmatmul.mubr.f32.gmra.mxu0 %v441_v3  ;;  %726 = vmatprep.subr.mxu0 %v553_v6 }
 0x1cc   :  { %727 = vmatpush3.msra.mxu0 %v553_v6 }
 0x1cd   :  { %728 = vmatprep.subr.mxu0 %v552_v7 }
 0x1ce   :  { %729 = vmatpush3.msra.mxu0 %v552_v7 }
 0x287   :  { %v710_v8 = vpop.f32.mrf.mxu0 }
 0x289   :  { %v711_v9 = vpop.f32.mrf.mxu0 }
 0x28a   :  { %v712_v10 = vadd.f32 %v711_v9, %v710_v8 }
 0x28b   :  { %v713_v11 = vpop.f32.mrf.mxu0 }
 0x28c   :  { %v550_v12 = vmax.f32 %v712_v10, 0.0 }
 0x28d   :  { %v714_v13 = vpop.f32.mrf.mxu0 }
 0x28e   :  { %v715_v14 = vadd.f32 %v714_v13, %v713_v11  ;;  %730 = vmatprep.mubr.msk.f32.mxu0 %vm563_vm2, %v550_v12 }
 0x290   :  { %v551_v15 = vmax.f32 %v715_v14, 0.0 }
 0x292   :  { %731 = vmatmul.mubr.msk.f32.vlgmr.msra.gmra.mxu0 %vm563_vm2, %v551_v15 }
 0x352   :  { %v732_v17 = vpop.f32.mrf.mxu0 }
 0x353   :  { %v642_v18 = vadd.f32 %v732_v17, %v675_v16 }
 0x354   :  { %v636_v19 = vpop.f32.mrf.mxu0 }
 0x355   :  { %646 = vst.msk [vmem:[#allocation2 + $0x8] sm:$0xff] %vm246_vm1, %v642_v18  ;;  %v637_v20 = vadd.f32 %v675_v16, %v636_v19 }
 0x357   :  { %645 = vst.msk [vmem:[#allocation2] sm:$0xff] %vm246_vm1, %v637_v20 }
 0x358   :  { %772 = shalt.err (!%p769_p4)
}
 0x359   :  { %s785_s2 = smov 128   ;;  %s786_s6 = smov 8  }
 0x35a   :  { %658 = dma.vmem_to_hbm [thread:$0]  %s653_s23, 256, %s1077_s7, [#allocation3], %s785_s2, %s785_s2, %s786_s6  }
 0x35b   :  { %781 = dma.done.wait [#allocation3], 256  }
 0x35c   :  { %782 = vsyncadd [#allocation3], 4294967040 }
 0x35d   :  { %662 = vsyncpa [#allocation3], 1 }

</bundles_post_ra>
